<compile_context>
chip_gen: v7x
topology: tpu7x:2x2x1
jax: 0.10.0
libtpu: 0.0.40
codegen_flags: <defaults>
</compile_context>

<pallas_src>
import numpy as np
import jax
import jax.numpy as jnp
from jax import lax
from jax.experimental import pallas as pl
from jax.experimental.pallas import tpu as pltpu

# ---- WaveCell "buffers" (deterministic, set in-script; __init__ args) -------
DT = 0.05            # time step
H = 1.0              # geometry spatial discretization (geom.h)
CMAX = 1.0           # geometry max wave speed (geom.cmax)
SATDAMP_B0 = 0.1     # saturable damping amplitude  (> 0  -> branch active)
SATDAMP_UTH = 0.5    # saturable damping threshold
C_NL = 0.01          # Kerr-like nonlinearity       (!= 0 -> branch active)

# CFL stability criterion from WaveCell.__init__
assert DT <= 1.0 / CMAX * H / np.sqrt(2.0), "CFL stability criterion violated"

# Trace-time constants (folded into the kernel, no runtime scalar work).
_INV_DT = 1.0 / DT
_INV_DT2 = _INV_DT * _INV_DT
_TWO_INV_DT2 = 2.0 * _INV_DT2
_INV_H2 = 1.0 / (H * H)
_INV_UTH2 = 1.0 / (SATDAMP_UTH * SATDAMP_UTH)


# ----------------------------- kernel math -----------------------------------
def _laplacian_5pt_batched(y):
    """5-point Laplacian with zero (Dirichlet) padding; y is a (B, Nx, Ny) tile."""
    _, nx, ny = y.shape
    # Narrow iotas -> float edge masks, broadcast over batch and the other
    # spatial axis (shared across all B slabs of the block).
    ri = lax.broadcasted_iota(jnp.int32, (1, nx, 1), 1)
    ci = lax.broadcasted_iota(jnp.int32, (1, 1, ny), 2)
    m_im1 = (ri > 0).astype(y.dtype)
    m_ip1 = (ri < nx - 1).astype(y.dtype)
    m_jm1 = (ci > 0).astype(y.dtype)
    m_jp1 = (ci < ny - 1).astype(y.dtype)
    # y[:, i-1, j], y[:, i+1, j], y[:, i, j-1], y[:, i, j+1]; out-of-domain = 0.
    y_im1 = pltpu.roll(y, shift=1,      axis=1) * m_im1
    y_ip1 = pltpu.roll(y, shift=nx - 1, axis=1) * m_ip1
    y_jm1 = pltpu.roll(y, shift=1,      axis=2) * m_jm1
    y_jp1 = pltpu.roll(y, shift=ny - 1, axis=2) * m_jp1
    return (y_im1 + y_ip1 + y_jm1 + y_jp1 - 4.0 * y) * _INV_H2


def _step_compute(h1, h2, c_lin, rho, b_geom):
    """One WaveCell update on a (B, Nx, Ny) tile; maps are (1, Nx, Ny)."""
    h1_sq = h1 * h1               # shared by damping + Kerr terms

    # b = geom.b + rho * b0 / (1 + |h1/uth|^2)      (satdamp_b0 > 0)
    # (abs dropped: argument is squared anyway)
    sat = SATDAMP_B0 * pl.reciprocal(1.0 + h1_sq * _INV_UTH2, approx=False)
    b = b_geom + rho * sat

    # c = c_linear + rho * c_nl * h1^2              (c_nl != 0)
    c = c_lin + (rho * C_NL) * h1_sq

    lap = _laplacian_5pt_batched(h1)

    # y = (dt^-2 + b dt^-1)^-1 * ( 2/dt^2 h1 - (dt^-2 - b dt^-1) h2 + c^2 lap(h1) )
    bdt = b * _INV_DT
    pref = pl.reciprocal(_INV_DT2 + bdt, approx=False)
    return pref * (_TWO_INV_DT2 * h1 - (_INV_DT2 - bdt) * h2 + (c * c) * lap)


def wave_cell_kernel(h1_ref, h2_ref, maps_ref, y_ref):
    """Single time step on a (B_TILE, Nx, Ny) block; maps_ref is (3, Nx, Ny)."""
    y = _step_compute(h1_ref[...], h2_ref[...],
                      maps_ref[0][None], maps_ref[1][None], maps_ref[2][None])
    y_ref[...] = y.astype(y_ref.dtype)


def wave_rollout_kernel(h1_ref, h2_ref, maps_ref, y_ref, state_ref):
    """T fused steps; state_ref is a (2, B_TILE, Nx, Ny) rotating VMEM buffer."""
    t = pl.program_id(1)

    @pl.when(t == 0)
    def _():                       # load the initial fields once per batch tile
        state_ref[0] = h1_ref[...]
        state_ref[1] = h2_ref[...]

    cur = t & 1                    # slot holding the field at step t-1
    prev = 1 - cur                 # slot holding the field at step t-2
    h1 = state_ref[cur]
    h2 = state_ref[prev]
    y = _step_compute(h1, h2,
                      maps_ref[0][None], maps_ref[1][None], maps_ref[2][None])
    y_ref[...] = y.astype(y_ref.dtype)
    state_ref[prev] = y.astype(state_ref.dtype)   # becomes h1 of the next step


# ----------------------------- tiling / VMEM plan -----------------------------
def _vmem_capacity_bytes():
    try:
        info = pltpu.get_tpu_info()
        cap = getattr(info, "vmem_capacity_bytes", None)
        if cap:
            return int(cap)
    except Exception:
        pass
    return 64 << 20   # conservative fallback (v7x-class)


def _plan(n, nx, ny, itemsize, *, slabs_per_block, maps_bytes, min_grid_steps):
    """Pick batch tile + scoped VMEM limit per TPU generation."""
    cap = _vmem_capacity_bytes()
    if cap <= (96 << 20):            # v7x-class: 64 MiB VMEM per TensorCore
        vmem_cap = 48 << 20
        target_block_bytes = 2 << 20
    else:                            # v5e / v6e: 128 MiB VMEM
        vmem_cap = 100 << 20
        target_block_bytes = 8 << 20

    plane_bytes = max(nx * ny * itemsize, 1)
    bt = int(max(1, min(n, target_block_bytes // plane_bytes)))
    # Keep the pipeline in steady state (>= min_grid_steps tiles when possible).
    if min_grid_steps > 1 and n >= min_grid_steps and pl.cdiv(n, bt) < min_grid_steps:
        bt = int(max(1, pl.cdiv(n, min_grid_steps)))

    def vmem_need(bt_):
        # double-buffered I/O slabs + resident state + ~8 block-sized temporaries
        return slabs_per_block * bt_ * plane_bytes + maps_bytes + (2 << 20)

    while bt > 1 and vmem_need(bt) > vmem_cap:
        bt = max(1, bt // 2)
    # TODO(synk): Nx tiling with a 1-row halo for domains where bt=1 still
    # exceeds vmem_cap.
    vmem_limit = int(min(max(vmem_need(bt), 32 << 20), vmem_cap))
    return bt, vmem_limit


# ----------------------------- wrappers ---------------------------------------
def wave_cell_forward(h1, h2, c_linear, rho, b_geom):
    """Pallas implementation of WaveCell.forward -> (y, h1)."""
    n, nx, ny = h1.shape
    itemsize = jnp.dtype(h1.dtype).itemsize
    plane_bytes = nx * ny * itemsize
    maps = jnp.stack([c_linear, rho, b_geom], axis=0)   # one resident stream
    # 6 double-buffered I/O slabs + ~8 temps per block; maps double-buffered.
    bt, vmem_limit = _plan(n, nx, ny, itemsize,
                           slabs_per_block=14,
                           maps_bytes=2 * 3 * plane_bytes,
                           min_grid_steps=4)
    grid = (pl.cdiv(n, bt),)

    y = pl.pallas_call(
        wave_cell_kernel,
        out_shape=jax.ShapeDtypeStruct((n, nx, ny), h1.dtype),
        grid_spec=pltpu.PrefetchScalarGridSpec(
            num_scalar_prefetch=0,
            grid=grid,
            in_specs=[
                pl.BlockSpec((bt, nx, ny), lambda i: (i, 0, 0)),   # h1
                pl.BlockSpec((bt, nx, ny), lambda i: (i, 0, 0)),   # h2
                pl.BlockSpec((3, nx, ny), lambda i: (0, 0, 0)),    # maps (resident)
            ],
            out_specs=pl.BlockSpec((bt, nx, ny), lambda i: (i, 0, 0)),
        ),
        compiler_params=pltpu.CompilerParams(
            dimension_semantics=("parallel",),
            vmem_limit_bytes=vmem_limit),
    )(h1, h2, maps)
    return y, h1


def wave_cell_rollout(h1, h2, c_linear, rho, b_geom, num_steps):
    """num_steps fused WaveCell steps; returns y for every step: (T, N, Nx, Ny)."""
    n, nx, ny = h1.shape
    itemsize = jnp.dtype(h1.dtype).itemsize
    plane_bytes = nx * ny * itemsize
    maps = jnp.stack([c_linear, rho, b_geom], axis=0)
    # 2 resident state slabs + 4 dbl-buffered input slabs + 2 output + ~8 temps.
    bt, vmem_limit = _plan(n, nx, ny, itemsize,
                           slabs_per_block=16,
                           maps_bytes=2 * 3 * plane_bytes,
                           min_grid_steps=1)
    grid = (pl.cdiv(n, bt), num_steps)

    y_all = pl.pallas_call(
        wave_rollout_kernel,
        out_shape=jax.ShapeDtypeStruct((num_steps, n, nx, ny), h1.dtype),
        grid_spec=pltpu.PrefetchScalarGridSpec(
            num_scalar_prefetch=0,
            grid=grid,
            in_specs=[
                pl.BlockSpec((bt, nx, ny), lambda i, t: (i, 0, 0)),   # h1 (t==0 only)
                pl.BlockSpec((bt, nx, ny), lambda i, t: (i, 0, 0)),   # h2 (t==0 only)
                pl.BlockSpec((3, nx, ny), lambda i, t: (0, 0, 0)),    # maps (resident)
            ],
            out_specs=pl.BlockSpec((None, bt, nx, ny),
                                   lambda i, t: (t, i, 0, 0)),
            scratch_shapes=[pltpu.VMEM((2, bt, nx, ny), h1.dtype)],
        ),
        compiler_params=pltpu.CompilerParams(
            dimension_semantics=("parallel", "arbitrary"),
            vmem_limit_bytes=vmem_limit),
    )(h1, h2, maps)
    return y_all


# ---- pure-JAX reference (mirrors the PyTorch math) --------------------------
def _ref_laplacian(y, h):
    yp = jnp.pad(y, ((0, 0), (1, 1), (1, 1)))
    return (yp[:, :-2, 1:-1] + yp[:, 2:, 1:-1] +
            yp[:, 1:-1, :-2] + yp[:, 1:-1, 2:] - 4.0 * y) / (h * h)


def wave_cell_ref(h1, h2, c_linear, rho, b_geom):
    b = b_geom[None] + rho[None] * (SATDAMP_B0 / (1.0 + jnp.abs(h1 / SATDAMP_UTH) ** 2))
    c = c_linear[None] + rho[None] * C_NL * h1 ** 2
    lap = _ref_laplacian(h1, H)
    dt = DT
    y = (1.0 / (dt ** -2 + b * dt ** -1)) * (
        2.0 / dt ** 2 * h1 - (dt ** -2 - b * dt ** -1) * h2 + c ** 2 * lap)
    return y, h1


def wave_cell_rollout_ref(h1, h2, c_linear, rho, b_geom, num_steps):
    ys = []
    for _ in range(num_steps):
        y, _ = wave_cell_ref(h1, h2, c_linear, rho, b_geom)
        ys.append(y)
        h2, h1 = h1, y
    return jnp.stack(ys, axis=0)


if __name__ == "__main__":
    N, NX, NY = 4, 16, 128      # exercises the batched-block path
    T = 6                       # fused rollout length
    key = jax.random.PRNGKey(0)
    k1, k2, k3, k4, k5 = jax.random.split(key, 5)

    h1 = jax.random.normal(k1, (N, NX, NY), dtype=jnp.float32)
    h2 = jax.random.normal(k2, (N, NX, NY), dtype=jnp.float32)
    # linear wave speed in (0, cmax], projected density in [0, 1], damping >= 0
    c_linear = 0.5 + 0.5 * jax.random.uniform(k3, (NX, NY), dtype=jnp.float32)
    rho = jax.random.uniform(k4, (NX, NY), dtype=jnp.float32)
    b_geom = 0.1 * jax.random.uniform(k5, (NX, NY), dtype=jnp.float32)

    # --- single step (module forward semantics) ---
    y, h1_out = jax.jit(wave_cell_forward)(h1, h2, c_linear, rho, b_geom)
    jax.block_until_ready((y, h1_out))
    y_ref, h1_ref_out = wave_cell_ref(h1, h2, c_linear, rho, b_geom)
    np.testing.assert_allclose(np.asarray(y), np.asarray(y_ref), rtol=1e-5, atol=1e-5)
    np.testing.assert_allclose(np.asarray(h1_out), np.asarray(h1_ref_out))

    # --- fused T-step rollout (VMEM-resident state) ---
    y_all = jax.jit(wave_cell_rollout, static_argnums=5)(
        h1, h2, c_linear, rho, b_geom, T)
    jax.block_until_ready(y_all)
    y_all_ref = wave_cell_rollout_ref(h1, h2, c_linear, rho, b_geom, T)
    np.testing.assert_allclose(np.asarray(y_all), np.asarray(y_all_ref),
                               rtol=2e-5, atol=2e-5)

    print("KERNEL_OK")
</pallas_src>

<mosaic_0001>
module attributes {stable_mosaic.version = 11 : i64} {
  func.func @wave_cell_kernel(%arg0: i32, %arg1: memref<1x16x128xf32, #tpu.memory_space<vmem>>, %arg2: memref<1x16x128xf32, #tpu.memory_space<vmem>>, %arg3: memref<3x16x128xf32, #tpu.memory_space<vmem>>, %arg4: memref<1x16x128xf32, #tpu.memory_space<vmem>>) attributes {dimension_semantics = [#tpu.dimension_semantics<parallel>], iteration_bounds = array<i64: 4>, scalar_prefetch = 0 : i64, scratch_operands = 0 : i64, tpu.core_type = #tpu.core_type<tc>, window_params = [{transform_indices = @transform_0, window_bounds = array<i64: 1, 16, 128>}, {transform_indices = @transform_1, window_bounds = array<i64: 1, 16, 128>}, {pipeline_mode = #tpu.pipeline_mode<synchronous>, transform_indices = @transform_2, window_bounds = array<i64: 3, 16, 128>}, {transform_indices = @transform_3, window_bounds = array<i64: 1, 16, 128>}]} {
    %c0 = arith.constant 0 : index
    %c0_0 = arith.constant 0 : index
    %c0_1 = arith.constant 0 : index
    %0 = vector.load %arg1[%c0, %c0_0, %c0_1] : memref<1x16x128xf32, #tpu.memory_space<vmem>>, vector<1x16x128xf32>
    %c0_2 = arith.constant 0 : index
    %c0_3 = arith.constant 0 : index
    %c0_4 = arith.constant 0 : index
    %1 = vector.load %arg2[%c0_2, %c0_3, %c0_4] : memref<1x16x128xf32, #tpu.memory_space<vmem>>, vector<1x16x128xf32>
    %c0_5 = arith.constant 0 : index
    %c0_6 = arith.constant 0 : index
    %c0_7 = arith.constant 0 : index
    %2 = vector.load %arg3[%c0_5, %c0_6, %c0_7] : memref<3x16x128xf32, #tpu.memory_space<vmem>>, vector<1x16x128xf32>
    %3 = vector.shape_cast %2 : vector<1x16x128xf32> to vector<16x128xf32>
    %4 = vector.shape_cast %3 : vector<16x128xf32> to vector<1x16x128xf32>
    %c1 = arith.constant 1 : index
    %c0_8 = arith.constant 0 : index
    %c0_9 = arith.constant 0 : index
    %5 = vector.load %arg3[%c1, %c0_8, %c0_9] : memref<3x16x128xf32, #tpu.memory_space<vmem>>, vector<1x16x128xf32>
    %6 = vector.shape_cast %5 : vector<1x16x128xf32> to vector<16x128xf32>
    %7 = vector.shape_cast %6 : vector<16x128xf32> to vector<1x16x128xf32>
    %c2 = arith.constant 2 : index
    %c0_10 = arith.constant 0 : index
    %c0_11 = arith.constant 0 : index
    %8 = vector.load %arg3[%c2, %c0_10, %c0_11] : memref<3x16x128xf32, #tpu.memory_space<vmem>>, vector<1x16x128xf32>
    %9 = vector.shape_cast %8 : vector<1x16x128xf32> to vector<16x128xf32>
    %10 = vector.shape_cast %9 : vector<16x128xf32> to vector<1x16x128xf32>
    %11 = arith.mulf %0, %0 : vector<1x16x128xf32>
    %cst = arith.constant 4.000000e+00 : f32
    %12 = vector.broadcast %cst : f32 to vector<1x16x128xf32>
    %13 = arith.mulf %11, %12 : vector<1x16x128xf32>
    %cst_12 = arith.constant 1.000000e+00 : f32
    %14 = vector.broadcast %cst_12 : f32 to vector<1x16x128xf32>
    %15 = arith.addf %14, %13 : vector<1x16x128xf32>
    %16 = tpu.reciprocal %15 : vector<1x16x128xf32> -> vector<1x16x128xf32>
    %cst_13 = arith.constant 1.000000e-01 : f32
    %17 = vector.broadcast %cst_13 : f32 to vector<1x16x128xf32>
    %18 = arith.mulf %17, %16 : vector<1x16x128xf32>
    %19 = arith.mulf %7, %18 : vector<1x16x128xf32>
    %20 = arith.addf %10, %19 : vector<1x16x128xf32>
    %cst_14 = arith.constant 0.00999999977 : f32
    %21 = vector.broadcast %cst_14 : f32 to vector<1x16x128xf32>
    %22 = arith.mulf %7, %21 : vector<1x16x128xf32>
    %23 = arith.mulf %22, %11 : vector<1x16x128xf32>
    %24 = arith.addf %4, %23 : vector<1x16x128xf32>
    %25 = tpu.iota {dimensions = array<i32: 1>} : vector<1x16x1xi32>
    %26 = tpu.iota {dimensions = array<i32: 2>} : vector<1x1x128xi32>
    %c0_i32 = arith.constant 0 : i32
    %27 = vector.broadcast %c0_i32 : i32 to vector<1x16x1xi32>
    %28 = arith.cmpi sgt, %25, %27 : vector<1x16x1xi32>
    %29 = arith.extui %28 : vector<1x16x1xi1> to vector<1x16x1xi32>
    %30 = arith.sitofp %29 : vector<1x16x1xi32> to vector<1x16x1xf32>
    %c15_i32 = arith.constant 15 : i32
    %31 = vector.broadcast %c15_i32 : i32 to vector<1x16x1xi32>
    %32 = arith.cmpi slt, %25, %31 : vector<1x16x1xi32>
    %33 = arith.extui %32 : vector<1x16x1xi1> to vector<1x16x1xi32>
    %34 = arith.sitofp %33 : vector<1x16x1xi32> to vector<1x16x1xf32>
    %c0_i32_15 = arith.constant 0 : i32
    %35 = vector.broadcast %c0_i32_15 : i32 to vector<1x1x128xi32>
    %36 = arith.cmpi sgt, %26, %35 : vector<1x1x128xi32>
    %37 = arith.extui %36 : vector<1x1x128xi1> to vector<1x1x128xi32>
    %38 = arith.sitofp %37 : vector<1x1x128xi32> to vector<1x1x128xf32>
    %c127_i32 = arith.constant 127 : i32
    %39 = vector.broadcast %c127_i32 : i32 to vector<1x1x128xi32>
    %40 = arith.cmpi slt, %26, %39 : vector<1x1x128xi32>
    %41 = arith.extui %40 : vector<1x1x128xi1> to vector<1x1x128xi32>
    %42 = arith.sitofp %41 : vector<1x1x128xi32> to vector<1x1x128xf32>
    %c1_i32 = arith.constant 1 : i32
    %43 = tpu.dynamic_rotate %0 by %c1_i32 dim 1 : vector<1x16x128xf32>, i32 -> vector<1x16x128xf32>
    %44 = vector.broadcast %30 : vector<1x16x1xf32> to vector<1x16x128xf32>
    %45 = arith.mulf %43, %44 : vector<1x16x128xf32>
    %c15_i32_16 = arith.constant 15 : i32
    %46 = tpu.dynamic_rotate %0 by %c15_i32_16 dim 1 : vector<1x16x128xf32>, i32 -> vector<1x16x128xf32>
    %47 = vector.broadcast %34 : vector<1x16x1xf32> to vector<1x16x128xf32>
    %48 = arith.mulf %46, %47 : vector<1x16x128xf32>
    %c1_i32_17 = arith.constant 1 : i32
    %49 = tpu.dynamic_rotate %0 by %c1_i32_17 dim 2 : vector<1x16x128xf32>, i32 -> vector<1x16x128xf32>
    %50 = vector.broadcast %38 : vector<1x1x128xf32> to vector<1x16x128xf32>
    %51 = arith.mulf %49, %50 : vector<1x16x128xf32>
    %c127_i32_18 = arith.constant 127 : i32
    %52 = tpu.dynamic_rotate %0 by %c127_i32_18 dim 2 : vector<1x16x128xf32>, i32 -> vector<1x16x128xf32>
    %53 = vector.broadcast %42 : vector<1x1x128xf32> to vector<1x16x128xf32>
    %54 = arith.mulf %52, %53 : vector<1x16x128xf32>
    %55 = arith.addf %45, %48 : vector<1x16x128xf32>
    %56 = arith.addf %55, %51 : vector<1x16x128xf32>
    %57 = arith.addf %56, %54 : vector<1x16x128xf32>
    %cst_19 = arith.constant 4.000000e+00 : f32
    %58 = vector.broadcast %cst_19 : f32 to vector<1x16x128xf32>
    %59 = arith.mulf %58, %0 : vector<1x16x128xf32>
    %60 = arith.subf %57, %59 : vector<1x16x128xf32>
    %cst_20 = arith.constant 1.000000e+00 : f32
    %61 = vector.broadcast %cst_20 : f32 to vector<1x16x128xf32>
    %62 = arith.mulf %60, %61 : vector<1x16x128xf32>
    %cst_21 = arith.constant 2.000000e+01 : f32
    %63 = vector.broadcast %cst_21 : f32 to vector<1x16x128xf32>
    %64 = arith.mulf %20, %63 : vector<1x16x128xf32>
    %cst_22 = arith.constant 4.000000e+02 : f32
    %65 = vector.broadcast %cst_22 : f32 to vector<1x16x128xf32>
    %66 = arith.addf %65, %64 : vector<1x16x128xf32>
    %67 = tpu.reciprocal %66 : vector<1x16x128xf32> -> vector<1x16x128xf32>
    %cst_23 = arith.constant 8.000000e+02 : f32
    %68 = vector.broadcast %cst_23 : f32 to vector<1x16x128xf32>
    %69 = arith.mulf %68, %0 : vector<1x16x128xf32>
    %cst_24 = arith.constant 4.000000e+02 : f32
    %70 = vector.broadcast %cst_24 : f32 to vector<1x16x128xf32>
    %71 = arith.subf %70, %64 : vector<1x16x128xf32>
    %72 = arith.mulf %71, %1 : vector<1x16x128xf32>
    %73 = arith.subf %69, %72 : vector<1x16x128xf32>
    %74 = arith.mulf %24, %24 : vector<1x16x128xf32>
    %75 = arith.mulf %74, %62 : vector<1x16x128xf32>
    %76 = arith.addf %73, %75 : vector<1x16x128xf32>
    %77 = arith.mulf %67, %76 : vector<1x16x128xf32>
    %c0_25 = arith.constant 0 : index
    %c0_26 = arith.constant 0 : index
    %c0_27 = arith.constant 0 : index
    %78 = vector.load %arg4[%c0_25, %c0_26, %c0_27] : memref<1x16x128xf32, #tpu.memory_space<vmem>>, vector<1x16x128xf32>
    tpu.vector_store %arg4[%c0_25, %c0_26, %c0_27], %77 {strides = array<i32>} : memref<1x16x128xf32, #tpu.memory_space<vmem>>, vector<1x16x128xf32>,
    return
  }
  func.func @transform_0(%arg0: i32) -> (i32, i32, i32) {
    %c0_i32 = arith.constant 0 : i32
    %c0_i32_0 = arith.constant 0 : i32
    %c0_i32_1 = arith.constant 0 : i32
    return %arg0, %c0_i32, %c0_i32_0 : i32, i32, i32
  }
  func.func @transform_1(%arg0: i32) -> (i32, i32, i32) {
    %c0_i32 = arith.constant 0 : i32
    %c0_i32_0 = arith.constant 0 : i32
    %c0_i32_1 = arith.constant 0 : i32
    return %arg0, %c0_i32, %c0_i32_0 : i32, i32, i32
  }
  func.func @transform_2(%arg0: i32) -> (i32, i32, i32) {
    %c0_i32 = arith.constant 0 : i32
    %c0_i32_0 = arith.constant 0 : i32
    %c0_i32_1 = arith.constant 0 : i32
    %c0_i32_2 = arith.constant 0 : i32
    return %c0_i32, %c0_i32_0, %c0_i32_1 : i32, i32, i32
  }
  func.func @transform_3(%arg0: i32) -> (i32, i32, i32) {
    %c0_i32 = arith.constant 0 : i32
    %c0_i32_0 = arith.constant 0 : i32
    %c0_i32_1 = arith.constant 0 : i32
    return %arg0, %c0_i32, %c0_i32_0 : i32, i32, i32
  }
}

</mosaic_0001>

<bundles_post_ra>
// kernel: wave_cell_forward.1
= control target key start
LH: loop header
LB: loop body
LE: loop exit
PB: predicated region body
PF: predicated region fallthrough
CT: control target
= control target key end

     0   :  { %8 = vsyncpa [#allocation3], 0  ;;  %s849_s0 = inlined_call_operand.vmem [shape: f32[4,16,128], index: 0, kind: input, shape index: {}]   ;;  %s850_s1 = inlined_call_operand.hbm [shape: f32[4,16,128], index: 1, kind: input, shape index: {}]   ;;  %s851_s2 = inlined_call_operand.vmem [shape: f32[3,16,128], index: 2, kind: input, shape index: {}]   ;;  %s852_s3 = inlined_call_operand.hbm [shape: f32[4,16,128], index: 3, kind: output, shape index: {}]  }
   0x1   :  { %10 = vsyncpa [#allocation3 + $0x1], 0 }
   0x2   :  { %11 = vsyncpa [#allocation4], 0 }
   0x3   :  { %13 = vsyncpa [#allocation4 + $0x1], 0  ;;  %s638_s12 = smov 0   ;;  %s640_s13 = smov 0  }
   0x4   :  { %s642_s14 = smov 0   ;;  %s644_s15 = smov 0  }
   0x5 LB: > { %s659_s16 = sadd.s32 4294967295, %s607_s15   ;;  %s423_s17 = sadd.s32 4294967294, %s607_s15   ;;  %s607_s15 = sphi %s644_s15, %s864_s15   ;;  %s603_s14 = sphi %s642_s14, %s863_s14   ;;  %s599_s13 = sphi %s640_s13, %s862_s13   ;;  %s595_s12 = sphi %s638_s12, %s861_s12  }
   0x6   : > { %s663_s18 = sadd.s32 1, %s607_s15   ;;  %s52_s19 = sadd.s32 1, %s603_s14 }
   0x7   : > { %s49_s20 = ssub.s32 %s607_s15, %s663_s18  ;;  %p59_p0 = scmp.ne.s32.totalorder %s603_s14, %s599_s13 }
   0x8   : > { %p50_p1 = scmp.eq.s32.totalorder %s49_s20, 0  ;;  %p60_p2 = scmp.eq.s32.totalorder %s607_s15, 0 }
   0x9   : > { %p65_p3 = scmp.ne.s32.totalorder %s599_s13, %s595_s12  ;;  %p66_p4 = scmp.eq.s32.totalorder %s659_s16, 0 }
   0xa   : > { %s675_s21 = scalar_select %p50_p1, %s603_s14, %s52_s19  }
   0xb   : > { %p677_p5 = por %p60_p2, %p59_p0  ;;  %p681_p6 = por %p66_p4, %p65_p3 }
   0xc   : > { %p110_p7 = scmp.eq.s32.totalorder %s659_s16, 3  ;;  %p116_p8 = scmp.eq.s32.totalorder %s423_s17, 3 }
   0xd   : > { %p462_p9 = scmp.lt.s32.totalorder %s607_s15, 4  ;;  %s147_s26 = sand.u32 1, %s603_s14  }
   0xe   : > { %p687_p10 = por %p110_p7, %p59_p0  ;;  %p691_p11 = por %p116_p8, %p65_p3 }
   0xf   : > { %s447_s27 = sshll.u32 %s607_s15, 8  ;;  %s426_s28 = sshll.u32 %s147_s26, 4 }
  0x10   : > { %s856_s24 = scalar_select %p687_p10, 1, 0 }
  0x11   : > { %s857_s25 = scalar_select %p691_p11, 1, 0 }
  0x12   : > { %s700_s4 = scalar_lea.hbm %s850_s1, %s447_s27  ;;  %s151_s5 = scalar_lea.vmem [#allocation2], %s426_s28 }
  0x13   : > { %s158_s6 = sshll.u32 %s151_s5, 4  ;;  %p704_p12 = pnand %p462_p9, %p677_p5  ;;  %s708_s6 = int_to_ptr.vmem [resolvable:$true] %s158_s6 }
  0x14   : > { %s710_s8 = scalar_lea.sflag [#allocation3], %s147_s26  ;;  %s511_s9 = scalar_lea.hbm %s700_s4, 256 }
  0x15   : > { %p512_p13 = scmp.ne.s32.totalorder %s700_s4, %s511_s9  ;;  %p513_p0 = pneg %p704_p12 }
  0x16   : > { %s516_s17 = scalar_lea.hbm %s850_s1, 1024  ;;  %p517_p3 = scmp.lt.u32.totalorder %s700_s4, %s850_s1 }
  0x17   : > { %p514_p1 = pnand %p513_p0, %p512_p13  ;;  %p518_p4 = scmp.lt.u32.totalorder %s516_s17, %s511_s9 }
  0x18   : > { %p520_p7 = scmp.lt.u32.totalorder %s511_s9, %s700_s4 }
  0x19   : > { %p515_p2 = pneg %p514_p1  ;;  %p519_p5 = por %p518_p4, %p517_p3 }
  0x1b   : > { %p521_p8 = por %p520_p7, %p519_p5 }
  0x1d   : > { %p522_p9 = pnand %p521_p8, %p515_p2 }
  0x1f   : > { %525 = shalt.err (!%p522_p9)
}
  0x20   : > { %s526_s22 = scalar_lea.vmem %s708_s6, 256  ;;  %s609_s26 = smov [#allocation2]  }
  0x21   : > { %p527_p13 = scmp.ne.s32.totalorder %s708_s6, %s526_s22  ;;  %s531_s27 = sshll.u32 %s609_s26, 4  ;;  %s532_s27 = int_to_ptr.vmem [resolvable:$false] %s531_s27 }
  0x22   : > { %s533_s28 = scalar_lea.vmem %s532_s27, 512  ;;  %p534_p10 = scmp.lt.s32.totalorder %s708_s6, %s532_s27 }
  0x23   : > { %p529_p1 = pnand %p527_p13, %p513_p0  ;;  %p535_p3 = scmp.lt.s32.totalorder %s533_s28, %s526_s22 }
  0x25   : > { %p530_p11 = pneg %p529_p1  ;;  %p536_p4 = por %p535_p3, %p534_p10 }
  0x27   : > { %p537_p5 = pnand %p536_p4, %p530_p11 }
  0x29   : > { %540 = shalt.err (!%p537_p5)
}
  0x2a   : > { %s610_s29 = smov 128   ;;  %s611_s30 = smov 8  }
  0x2b   : > { %457 = dma.hbm_to_vmem [thread:$0]  (!%p704_p12), %s700_s4, 256, %s708_s6, %s710_s8, %s610_s29, %s610_s29, %s611_s30  }
  0x2c   : > { %p429_p0 = scmp.ge.s32.totalorder %s607_s15, 1  ;;  %p166_p2 = scmp.lt.s32.totalorder %s607_s15, 5 }
  0x2e   : > { %p167_p7 = pnand %p429_p0, %p166_p2 }
  0x2f   : > { %s741_s5 = sand.u32 (!%p167_p7), 1, %s599_s13  }
  0x30   : > { %170 = sbr.rel (%p167_p7) target bundleno = 211 (0xd3), region = 32  ;;  %s430_s9 = sshll.u32 (!%p167_p7), %s741_s5, 4 }
  0x31   : > { %s173_s10 = scalar_lea.sflag (!%p167_p7), [#allocation3], %s741_s5  ;;  %s747_s11 = scalar_lea.vmem (!%p167_p7), [#allocation2], %s430_s9 }
  0x37   : > { %586 = dma.done.wait (%p681_p6), %s173_s10, 256  }
  0x38   : > { %588 = vsyncadd (%p681_p6), %s173_s10, 4294967040  ;;  %p204_p10 = scmp.lt.s32.totalorder %s659_s16, 3  ;;  %v241_v0 = vlaneseq  ;;  %v612_v5 = vmov 0.0   ;;  %s613_s23 = smov 1   ;;  %v434_v29 = vld [vmem:[%s851_s2 + $0x10] sm:$0xff]  ;;  %v436_v32 = vld [vmem:[%s851_s2 + $0x20] sm:$0xff] }
  0x39   : > { %s614_s19 = smov 127   ;;  %v435_v33 = vld [vmem:[%s851_s2 + $0x18] sm:$0xff]  ;;  %v437_v36 = vld [vmem:[%s851_s2 + $0x28] sm:$0xff]  ;;  %v235_v38 = vmul.f32 0.01, %v434_v29  ;;  %v213_v44 = vld [vmem:[%s851_s2] sm:$0xff] }
  0x3a   : > { %s205_s4 = scalar_select %p204_p10, %s659_s16, 3  ;;  %v242_v1 = vshrl.u32 %v241_v0, 7  ;;  %v245_v37 = vand.u32 127, %v241_v0  ;;  %v236_v45 = vmul.f32 0.01, %v435_v33  ;;  %v211_v50 = vld [vmem:[%s747_s11] sm:$0xff] }
  0x3b   : > { %v214_v58 = vld [vmem:[%s851_s2 + $0x8] sm:$0xff]  ;;  %s325_s26 = scalar_lea.sflag [#allocation4], %s741_s5  ;;  %p859_p11 = scmp.ne.s32.totalorder %s856_s24, 0 }
  0x3c   : > { %s448_s6 = sshll.u32 %s205_s4, 4  ;;  %vm246_vm0 = vcmp.gt.s32.totalorder %v242_v1, 0  ;;  %v243_v2 = vadd.s32 8, %v242_v1  ;;  %vm266_vm1 = vcmp.lt.s32.totalorder %v242_v1, 1  ;;  %vm273_vm2 = vcmp.lt.s32.totalorder %v242_v1, 7  ;;  %v212_v1 = vld [vmem:[%s747_s11 + $0x8] sm:$0xff] }
  0x3d   : > { %s208_s17 = scalar_lea.vmem %s849_s0, %s448_s6  ;;  %v438_v6 = vsel %vm246_vm0, 1.0, %v612_v5  ;;  %vm258_vm4 = vcmp.gt.s32.totalorder %v245_v37, 0  ;;  %vm261_vm5 = vcmp.lt.s32.totalorder %v245_v37, 127  ;;  %s449_s11 = sshll.u32 %s659_s16, 8 }
  0x3e   : > { %v758_v3 = vld [vmem:[%s208_s17] sm:$0xff]  ;;  %v760_v4 = vld [vmem:[%s208_s17 + $0x8] sm:$0xff]  ;;  %vm253_vm3 = vcmp.lt.s32.totalorder %v243_v2, 15  ;;  %v440_v46 = vsel %vm258_vm4, 1.0, %v612_v5  ;;  %v441_v47 = vsel %vm261_vm5, 1.0, %v612_v5  ;;  %s203_s17 = scalar_lea.vmem [#allocation5], %s430_s9  ;;  %s804_s22 = scalar_lea.hbm %s852_s3, %s449_s11 }
  0x3f   : > { %278 = vrot.lane.b32.xlu0 %v758_v3, %s613_s23  ;;  %284 = vrot.lane.b32.xlu1 %v758_v3, %s614_s19  ;;  %v265_v7 = vrot.slane %v760_v4, 7  ;;  %v272_v8 = vrot.slane %v760_v4, 1  ;;  %v264_v9 = vrot.slane %v758_v3, 7  ;;  %v271_v10 = vrot.slane %v758_v3, 1  ;;  %s615_s9 = smov [#allocation5]  }
  0x40   : > { %v439_v13 = vsel %vm253_vm3, 1.0, %v612_v5  ;;  %v221_v20 = vmul.f32 %v758_v3, %v758_v3  ;;  %v222_v22 = vmul.f32 %v760_v4, %v760_v4  ;;  %v296_v57 = vmul.f32 4.0, %v758_v3  ;;  %s545_s27 = sshll.u32 %s615_s9, 4  ;;  %s546_s27 = int_to_ptr.vmem [resolvable:$false] %s545_s27 }
  0x41   : > { %v268_v11 = vsel %vm266_vm1, %v265_v7, %v264_v9  ;;  %v274_v12 = vsel %vm273_vm2, %v271_v10, %v272_v8  ;;  %v267_v14 = vsel %vm266_vm1, %v264_v9, %v265_v7  ;;  %v275_v16 = vsel %vm273_vm2, %v272_v8, %v271_v10  ;;  %s547_s28 = scalar_lea.vmem %s546_s27, 512 }
  0x42   : > { %v269_v15 = vmul.f32 %v438_v6, %v268_v11  ;;  %v277_v17 = vmul.f32 %v439_v13, %v275_v16  ;;  %v223_v21 = vmul.f32 4.0, %v221_v20  ;;  %v224_v24 = vmul.f32 4.0, %v222_v22 }
  0x43   : > { %280 = vrot.lane.b32.xlu0 %v760_v4, %s613_s23  ;;  %286 = vrot.lane.b32.xlu1 %v760_v4, %s614_s19  ;;  %v237_v41 = vmul.f32 %v235_v38, %v221_v20  ;;  %v238_v56 = vmul.f32 %v236_v45, %v222_v22  ;;  %v306_v60 = vmul.f32 800.0, %v758_v3  ;;  %v297_v9 = vmul.f32 4.0, %v760_v4  ;;  %s338_s23 = sshll.u32 %s203_s17, 4  ;;  %s806_s23 = int_to_ptr.vmem [resolvable:$true] %s338_s23 }
  0x44   : > { %v290_v18 = vadd.f32 %v274_v12, %v269_v15  ;;  %v291_v19 = vadd.f32 %v277_v17, %v267_v14  ;;  %v225_v23 = vadd.f32 1.0, %v223_v21  ;;  %v226_v25 = vadd.f32 1.0, %v224_v24  ;;  %s541_s16 = scalar_lea.vmem %s806_s23, 256  ;;  %p548_p9 = scmp.lt.s32.totalorder %s806_s23, %s546_s27 }
  0x45   : > { %v239_v52 = vadd.f32 %v237_v41, %v213_v44  ;;  %v240_v7 = vadd.f32 %v238_v56, %v214_v58  ;;  %v307_v10 = vmul.f32 800.0, %v760_v4  ;;  %p542_p6 = scmp.ne.s32.totalorder %s806_s23, %s541_s16  ;;  %p549_p13 = scmp.lt.s32.totalorder %s547_s28, %s541_s16 }
  0x46   : > { %503 = vrcp.f32 %v225_v23 }
  0x47   : > { %505 = vrcp.f32 %v226_v25  ;;  %v314_v63 = vmul.f32 %v239_v52, %v239_v52  ;;  %v315_v15 = vmul.f32 %v240_v7, %v240_v7  ;;  %p543_p12 = pnand %p542_p6, %p859_p11  ;;  %p550_p1 = por %p549_p13, %p548_p9 }
  0x49   : > { %p544_p8 = pneg %p543_p12 }
  0x4b   : > { %p551_p3 = pnand %p550_p1, %p544_p8 }
  0x50   : > { %v504_v26 = vpop.eup %503 }
  0x51   : > { %v229_v27 = vmul.f32 0.1, %v504_v26  ;;  %v506_v28 = vpop.eup %505 }
  0x52   : > { %v230_v31 = vmul.f32 0.1, %v506_v28 }
  0x53   : > { %v231_v30 = vmul.f32 %v434_v29, %v229_v27 }
  0x54   : > { %v232_v35 = vmul.f32 %v435_v33, %v230_v31 }
  0x55   : > { %v233_v34 = vadd.f32 %v436_v32, %v231_v30 }
  0x56   : > { %v234_v40 = vadd.f32 %v437_v36, %v232_v35 }
  0x57   : > { %v300_v39 = vmul.f32 20.0, %v233_v34 }
  0x58   : > { %v301_v43 = vmul.f32 20.0, %v234_v40 }
  0x59   : > { %v302_v42 = vadd.f32 400.0, %v300_v39  ;;  %v308_v48 = vsub.f32 400.0, %v300_v39 }
  0x5a   : > { %v303_v53 = vadd.f32 400.0, %v301_v43  ;;  %v309_v62 = vsub.f32 400.0, %v301_v43 }
  0x5b   : > { %507 = vrcp.f32 %v302_v42  ;;  %v310_v61 = vmul.f32 %v308_v48, %v211_v50 }
  0x5c   : > { %509 = vrcp.f32 %v303_v53  ;;  %v311_v13 = vmul.f32 %v309_v62, %v212_v1 }
  0x5d   : > { %v312_v12 = vsub.f32 %v306_v60, %v310_v61 }
  0x5e   : > { %v313_v20 = vsub.f32 %v307_v10, %v311_v13 }
  0x65   : > { %v508_v17 = vpop.eup %507 }
  0x66   : > { %v510_v4 = vpop.eup %509 }
  0xb1   : > { %v279_v49 = vpop.permute.xlu0 %278  ;;  %v285_v51 = vpop.permute.xlu1 %284 }
  0xb2   : > { %v282_v54 = vmul.f32 %v440_v46, %v279_v49  ;;  %v288_v55 = vmul.f32 %v441_v47, %v285_v51 }
  0xb4   : > { %v292_v59 = vadd.f32 %v290_v18, %v282_v54 }
  0xb5   : > { %v281_v0 = vpop.permute.xlu0 %280  ;;  %v287_v2 = vpop.permute.xlu1 %286 }
  0xb6   : > { %v294_v5 = vadd.f32 %v292_v59, %v288_v55  ;;  %v283_v6 = vmul.f32 %v440_v46, %v281_v0  ;;  %v289_v8 = vmul.f32 %v441_v47, %v287_v2 }
  0xb8   : > { %v298_v11 = vsub.f32 %v294_v5, %v296_v57  ;;  %v293_v3 = vadd.f32 %v291_v19, %v283_v6 }
  0xba   : > { %v316_v14 = vmul.f32 %v314_v63, %v298_v11  ;;  %v295_v16 = vadd.f32 %v293_v3, %v289_v8 }
  0xbc   : > { %v318_v18 = vadd.f32 %v316_v14, %v312_v12  ;;  %v299_v21 = vsub.f32 %v295_v16, %v297_v9 }
  0xbe   : > { %v320_v22 = vmul.f32 %v508_v17, %v318_v18  ;;  %v317_v23 = vmul.f32 %v315_v15, %v299_v21 }
  0xc0   : > { %322 = vst [vmem:[%s203_s17] sm:$0xff] %v320_v22  ;;  %v319_v24 = vadd.f32 %v317_v23, %v313_v20 }
  0xc2   : > { %v321_v19 = vmul.f32 %v510_v4, %v319_v24 }
  0xc4   : > { %323 = vst [vmem:[%s203_s17 + $0x8] sm:$0xff] %v321_v19 }
  0xc5   : > { %554 = shalt.err (!%p551_p3)
}
  0xc6   : > { %s555_s29 = scalar_lea.hbm %s804_s22, 256  ;;  %s559_s4 = scalar_lea.hbm %s852_s3, 1024 }
  0xc7   : > { %p556_p4 = scmp.ne.s32.totalorder %s804_s22, %s555_s29  ;;  %p560_p2 = scmp.lt.u32.totalorder %s804_s22, %s852_s3 }
  0xc8   : > { %p561_p7 = scmp.lt.u32.totalorder %s559_s4, %s555_s29  ;;  %p563_p6 = scmp.lt.u32.totalorder %s555_s29, %s804_s22 }
  0xc9   : > { %p557_p5 = pnand %p556_p4, %p859_p11 }
  0xca   : > { %p562_p10 = por %p561_p7, %p560_p2 }
  0xcb   : > { %p558_p0 = pneg %p557_p5 }
  0xcc   : > { %p564_p12 = por %p563_p6, %p562_p10 }
  0xce   : > { %p565_p8 = pnand %p564_p12, %p558_p0 }
  0xd0   : > { %568 = shalt.err (!%p565_p8)
}
  0xd1   : > { %s616_s8 = smov 128   ;;  %s617_s11 = smov 8  }
  0xd2   : > { %452 = dma.vmem_to_hbm [thread:$0]  (%p859_p11), %s806_s23, 256, %s804_s22, %s325_s26, %s616_s8, %s616_s8, %s617_s11  }
  0xd3 PF: > { %p463_p9 = scmp.ge.s32.totalorder %s607_s15, 2  ;;  %s353_s17 = sand.u32 1, %s595_s12  }
  0xd4   : > { %p860_p13 = scmp.ne.s32.totalorder %s857_s25, 0  ;;  %s354_s19 = scalar_lea.sflag [#allocation4], %s353_s17 }
  0xd6   : > { %p459_p1 = pnand %p463_p9, %p860_p13 }
  0xd8   : > { %590 = dma.done.wait (!%p459_p1), %s354_s19, 256  }
  0xd9   : > { %592 = vsyncadd (!%p459_p1), %s354_s19, 4294967040  ;;  %p16_p3 = scmp.ge.s32.totalorder %s663_s18, 6   ;;  %s861_s12 = smov %s599_s13 }
  0xda   : > { %s862_s13 = smov %s603_s14  ;;  %s863_s14 = smov %s675_s21 }
  0xdb   : > { %s864_s15 = smov %s663_s18  ;;  %18 = sbr.rel (!%p16_p3) target bundleno = 5 (0x5), region = 82 }
  0xe2   :  { %359 = vsyncpa [#allocation3], 1 }
  0xe3   :  { %361 = vsyncpa [#allocation3 + $0x1], 1 }
  0xe4   :  { %362 = vsyncpa [#allocation4], 1 }
  0xe5   :  { %364 = vsyncpa [#allocation4 + $0x1], 1 }

</bundles_post_ra>
